<compile_context>
chip_gen: v7x
topology: tpu7x:2x2x1
jax: 0.10.0
libtpu: 0.0.40
codegen_flags: <defaults>
</compile_context>

<pallas_src>
import functools

import numpy as np
import jax
import jax.numpy as jnp
from jax.experimental import pallas as pl
from jax.experimental.pallas import tpu as pltpu

_LANE = 128
_SUBLANE = 8


def _spatial_agg_kernel(kt_ref, dist_ref, x_ref, o_ref, w_ref, *, k_scale):
    # kt_ref  : (K_B, J, 1)      f32   kappa_t rows for this rule block (torch unsqueeze(-1))
    # dist_ref: (J, J)           f32   full phylogenetic distance matrix (grid-invariant)
    # x_ref   : (J, T_LANE)      bf16  lane tile of the (J, S*T) time-series slab
    # o_ref   : (K_B, J, T_LANE) f32   output tile for this (rule block, lane tile)
    # w_ref   : (K_B*J, J)       bf16  scratch: cached unnormalized OTU weights

    # Rebuild the weight matrix only when the rule block changes; it is reused
    # for every lane tile of this rule block (EUP work off the MXU path).
    @pl.when(pl.program_id(1) == 0)
    def _():
        kt = kt_ref[...]                                                 # (K_B, J, 1) f32
        w = jax.nn.sigmoid((kt - dist_ref[...][None, :, :]) * k_scale)   # (K_B, J, J) f32
        # J % 8 == 0 (or K_B == 1) is guaranteed by the tiling picker, so this
        # reshape is a free sublane collapse.
        w_ref[...] = w.reshape(w_ref.shape).astype(w_ref.dtype)

    # Single MXU matmul: (K_B*J, J) x (J, T_LANE), f32 accumulation.
    acc = jnp.dot(w_ref[...], x_ref[...], preferred_element_type=jnp.float32)
    o_ref[...] = acc.reshape(o_ref.shape).astype(o_ref.dtype)


def _choose_tiling(K, J, ST, *, target_m=512, buf_budget_bytes=24 << 20):
    """Pick (rule block K_B, lane tile T_LANE, VMEM footprint in bytes)."""
    # Rule block: stack K_B rules along the MXU M dimension.  Restrict to
    # divisors of K (every grid step full) and to J % 8 == 0 so the in-kernel
    # (K_B, J, J) -> (K_B*J, J) reshape is a free sublane collapse.
    k_b = 1
    if J % _SUBLANE == 0:
        for cand in range(1, K + 1):
            if K % cand == 0 and cand * J <= target_m:
                k_b = cand

    def footprint(t_lane):
        return (2 * J * t_lane * 2            # x tile, bf16, double buffered
                + 2 * k_b * J * t_lane * 4    # out tile, f32, double buffered
                + k_b * J * J * 2             # cached W scratch, bf16
                + 2 * J * J * 4               # dist, f32, double buffered
                + 2 * k_b * J * _LANE * 4)    # kappa_t block (lane padded to 128)

    # Lane tile over the flattened S*T axis: as big as the VMEM budget allows.
    if ST <= 8192 and footprint(ST) <= buf_budget_bytes:
        t_lane = ST                           # single full-width (lane-dense) tile
    else:
        t_lane = _LANE
        for cand in (256, 512, 1024, 2048, 4096):
            if cand < ST and footprint(cand) <= buf_budget_bytes:
                t_lane = cand
    return k_b, t_lane, footprint(t_lane)


def spatial_agg(kappa, dist, x, k=1.0):
    """Pallas equivalent of SpatialAgg.forward.

    kappa: (K, J) float32 parameter (num_rules, num_otus)
    dist:  (J, J) float32 distance buffer
    x:     (S, J, T) float32 time-series ('sjt')
    returns (S, K, J, T) float32 ('skit')
    """
    K, J = kappa.shape
    S, J2, T = x.shape
    assert J == J2
    ST = S * T

    # transf_log(kappa, 0, dist.max()) computed on device (jit / sharding safe).
    dist_f = dist.astype(jnp.float32)
    dmax = jnp.max(dist_f)
    kappa_t3 = (dmax * (1.0 - jax.nn.sigmoid(kappa.astype(jnp.float32)))).reshape(K, J, 1)

    # Layout plumbing: lane-dense (J, S*T) slab; bf16 halves DMA bytes and
    # doubles MXU rate (f32 accumulation preserved inside the kernel).
    x_flat = jnp.transpose(x, (1, 0, 2)).reshape(J, ST).astype(jnp.bfloat16)

    K_B, T_LANE, fp = _choose_tiling(K, J, ST)
    grid = (K // K_B, pl.cdiv(ST, T_LANE))

    kernel = functools.partial(_spatial_agg_kernel, k_scale=float(k))

    cost = pl.CostEstimate(
        flops=2 * K * J * J * ST,
        transcendentals=K * J * J,                       # one sigmoid per weight entry
        bytes_accessed=(grid[0] * J * ST * 2             # x re-read once per rule block (bf16)
                        + K * J * ST * 4                 # output (f32)
                        + J * J * 4 + K * J * 4),        # dist + kappa_t
    )

    # Scoped-VMEM cap: actual footprint + headroom, safe on v7x (64 MiB VMEM).
    vmem_limit = int(min(max(fp + (8 << 20), 32 << 20), 56 << 20))

    out3 = pl.pallas_call(
        kernel,
        out_shape=jax.ShapeDtypeStruct((K, J, ST), jnp.float32),
        grid_spec=pltpu.PrefetchScalarGridSpec(
            num_scalar_prefetch=0,
            grid=grid,                                             # (rule blocks, lane tiles)
            in_specs=[
                pl.BlockSpec((K_B, J, 1), lambda r, t: (r, 0, 0)),  # kappa_t rows (tiny)
                pl.BlockSpec((J, J), lambda r, t: (0, 0)),          # dist, DMA'd once
                pl.BlockSpec((J, T_LANE), lambda r, t: (0, t)),     # x lane tile
            ],
            out_specs=pl.BlockSpec((K_B, J, T_LANE), lambda r, t: (r, 0, t)),
            scratch_shapes=[pltpu.VMEM((K_B * J, J), jnp.bfloat16)],  # cached W
        ),
        compiler_params=pltpu.CompilerParams(
            dimension_semantics=("parallel", "arbitrary"),
            vmem_limit_bytes=vmem_limit,
        ),
        cost_estimate=cost,
    )(kappa_t3, dist_f, x_flat)

    # (K, J, S*T) -> (K, J, S, T) -> (S, K, J, T).
    # TODO(synk): if downstream accepted (K, J, S, T) this transpose (and the
    # input one) could be dropped; kept for exact 'skit' parity with torch.
    return jnp.transpose(out3.reshape(K, J, S, T), (2, 0, 1, 3))


def spatial_agg_ref(kappa, dist, x, k=1.0):
    """Pure-JAX f32 reference mirroring the torch code."""
    dmax = jnp.max(dist)
    kap = (dmax * (1.0 - jax.nn.sigmoid(kappa)))[:, :, None]       # (K, J, 1)
    w = jax.nn.sigmoid((kap - dist[None, :, :]) * k)               # (K, J, J)
    return jnp.einsum('kij,sjt->skit', w, x)


# TODO(synk): the torch NaN check / print / raise and the `self.wts` attribute
# stash are host-side debug behavior with no Pallas equivalent; omitted.


if __name__ == "__main__":
    # Small, deterministic shapes: num_rules=4, num_otus=16, samples=2, time=8.
    K, J, S, T = 4, 16, 2, 8
    key = jax.random.PRNGKey(0)
    k1, k2, k3 = jax.random.split(key, 3)

    kappa = jax.random.normal(k1, (K, J), dtype=jnp.float32)

    # Deterministic symmetric non-negative "phylogenetic" distance, zero diagonal.
    d = jnp.abs(jax.random.normal(k2, (J, J), dtype=jnp.float32))
    dist = 0.5 * (d + d.T) * (1.0 - jnp.eye(J, dtype=jnp.float32))

    x = jax.random.normal(k3, (S, J, T), dtype=jnp.float32)

    out = spatial_agg(kappa, dist, x, k=1.0)
    out = jax.block_until_ready(out)

    ref = spatial_agg_ref(kappa, dist, x, k=1.0)
    assert out.shape == (S, K, J, T), out.shape
    # Tolerance loosened vs the f32 reference because W and x enter the MXU as
    # bf16 (with f32 accumulation); expected relative error ~1e-2.
    np.testing.assert_allclose(np.asarray(out), np.asarray(ref), rtol=2e-2, atol=5e-2)

    print("KERNEL_OK")
</pallas_src>

<mosaic_0001>
module attributes {stable_mosaic.version = 11 : i64} {
  func.func @_spatial_agg_kernel(%arg0: i32, %arg1: i32, %arg2: memref<4x16x1xf32, #tpu.memory_space<vmem>>, %arg3: memref<16x16xf32, #tpu.memory_space<vmem>>, %arg4: memref<16x16xbf16, #tpu.memory_space<vmem>>, %arg5: memref<4x16x16xf32, #tpu.memory_space<vmem>>, %arg6: memref<64x16xbf16, #tpu.memory_space<vmem>>) attributes {dimension_semantics = [#tpu.dimension_semantics<parallel>, #tpu.dimension_semantics<arbitrary>], iteration_bounds = array<i64: 1, 1>, scalar_prefetch = 0 : i64, scratch_operands = 1 : i64, tpu.core_type = #tpu.core_type<tc>, window_params = [{transform_indices = @transform_0, window_bounds = array<i64: 4, 16, 1>}, {pipeline_mode = #tpu.pipeline_mode<synchronous>, transform_indices = @transform_1, window_bounds = array<i64: 16, 16>}, {transform_indices = @transform_2, window_bounds = array<i64: 16, 16>}, {transform_indices = @transform_3, window_bounds = array<i64: 4, 16, 16>}]} {
    %c0_i32 = arith.constant 0 : i32
    %0 = arith.cmpi eq, %arg1, %c0_i32 : i32
    %1 = arith.extui %0 : i1 to i32
    %c0_i32_0 = arith.constant 0 : i32
    %2 = arith.cmpi ne, %1, %c0_i32_0 : i32
    scf.if %2 {
      %c0_7 = arith.constant 0 : index
      %c0_8 = arith.constant 0 : index
      %c0_9 = arith.constant 0 : index
      %8 = vector.load %arg2[%c0_7, %c0_8, %c0_9] : memref<4x16x1xf32, #tpu.memory_space<vmem>>, vector<4x16x1xf32>
      %c0_10 = arith.constant 0 : index
      %c0_11 = arith.constant 0 : index
      %9 = vector.load %arg3[%c0_10, %c0_11] : memref<16x16xf32, #tpu.memory_space<vmem>>, vector<16x16xf32>
      %10 = vector.shape_cast %9 : vector<16x16xf32> to vector<1x16x16xf32>
      %11 = vector.broadcast %8 : vector<4x16x1xf32> to vector<4x16x16xf32>
      %12 = vector.broadcast %10 : vector<1x16x16xf32> to vector<4x16x16xf32>
      %13 = arith.subf %11, %12 : vector<4x16x16xf32>
      %cst_12 = arith.constant 1.000000e+00 : f32
      %14 = vector.broadcast %cst_12 : f32 to vector<4x16x16xf32>
      %15 = arith.mulf %13, %14 : vector<4x16x16xf32>
      %16 = arith.negf %15 : vector<4x16x16xf32>
      %17 = math.exp %16 : vector<4x16x16xf32>
      %cst_13 = arith.constant 1.000000e+00 : f32
      %18 = vector.broadcast %cst_13 : f32 to vector<4x16x16xf32>
      %19 = arith.addf %18, %17 : vector<4x16x16xf32>
      %20 = arith.divf %18, %19 : vector<4x16x16xf32>
      %21 = vector.shape_cast %20 : vector<4x16x16xf32> to vector<64x16xf32>
      %22 = arith.truncf %21 : vector<64x16xf32> to vector<64x16xbf16>
      %c0_14 = arith.constant 0 : index
      %c0_15 = arith.constant 0 : index
      %23 = vector.load %arg6[%c0_14, %c0_15] : memref<64x16xbf16, #tpu.memory_space<vmem>>, vector<64x16xbf16>
      tpu.vector_store %arg6[%c0_14, %c0_15], %22 {strides = array<i32>} : memref<64x16xbf16, #tpu.memory_space<vmem>>, vector<64x16xbf16>,
    } else {
    }
    %c0 = arith.constant 0 : index
    %c0_1 = arith.constant 0 : index
    %3 = vector.load %arg6[%c0, %c0_1] : memref<64x16xbf16, #tpu.memory_space<vmem>>, vector<64x16xbf16>
    %c0_2 = arith.constant 0 : index
    %c0_3 = arith.constant 0 : index
    %4 = vector.load %arg4[%c0_2, %c0_3] : memref<16x16xbf16, #tpu.memory_space<vmem>>, vector<16x16xbf16>
    %cst = arith.constant dense<0.000000e+00> : vector<64x16xf32>
    %5 = tpu.matmul %3, %4, %cst {dimension_numbers = #tpu.dot_dimension_numbers<[1], [0], [0], [1], [0, 0, 1, 1], [], []>} : vector<64x16xbf16>, vector<16x16xbf16>, vector<64x16xf32> -> vector<64x16xf32>
    %6 = vector.shape_cast %5 : vector<64x16xf32> to vector<4x16x16xf32>
    %c0_4 = arith.constant 0 : index
    %c0_5 = arith.constant 0 : index
    %c0_6 = arith.constant 0 : index
    %7 = vector.load %arg5[%c0_4, %c0_5, %c0_6] : memref<4x16x16xf32, #tpu.memory_space<vmem>>, vector<4x16x16xf32>
    tpu.vector_store %arg5[%c0_4, %c0_5, %c0_6], %6 {strides = array<i32>} : memref<4x16x16xf32, #tpu.memory_space<vmem>>, vector<4x16x16xf32>,
    return
  }
  func.func @transform_0(%arg0: i32, %arg1: i32) -> (i32, i32, i32) {
    %c0_i32 = arith.constant 0 : i32
    %c0_i32_0 = arith.constant 0 : i32
    %c0_i32_1 = arith.constant 0 : i32
    return %arg0, %c0_i32, %c0_i32_0 : i32, i32, i32
  }
  func.func @transform_1(%arg0: i32, %arg1: i32) -> (i32, i32) {
    %c0_i32 = arith.constant 0 : i32
    %c0_i32_0 = arith.constant 0 : i32
    %c0_i32_1 = arith.constant 0 : i32
    return %c0_i32, %c0_i32_0 : i32, i32
  }
  func.func @transform_2(%arg0: i32, %arg1: i32) -> (i32, i32) {
    %c0_i32 = arith.constant 0 : i32
    %c0_i32_0 = arith.constant 0 : i32
    return %c0_i32, %arg1 : i32, i32
  }
  func.func @transform_3(%arg0: i32, %arg1: i32) -> (i32, i32, i32) {
    %c0_i32 = arith.constant 0 : i32
    %c0_i32_0 = arith.constant 0 : i32
    return %arg0, %c0_i32, %arg1 : i32, i32, i32
  }
}

</mosaic_0001>

<bundles_post_ra>
// kernel: tpu_custom_call.1
= control target key start
LH: loop header
LB: loop body
LE: loop exit
PB: predicated region body
PF: predicated region fallthrough
CT: control target
= control target key end

     0   :  { %v342_v2 = vmov 0   ;;  %s427_s0 = inlined_call_operand.vmem [shape: f32[4,16,1], index: 0, kind: input, shape index: {}]   ;;  %s428_s1 = inlined_call_operand.vmem [shape: f32[16,16], index: 1, kind: input, shape index: {}]   ;;  %s429_s2 = inlined_call_operand.vmem [shape: bf16[16,16], index: 2, kind: input, shape index: {}]   ;;  %s430_s3 = inlined_call_operand.hbm [shape: f32[4,16,16], index: 3, kind: output, shape index: {}]  }
   0x1   :  { %v24_v0 = vld [vmem:[%s427_s0 + $0x20] sm:$0xff]  ;;  %284 = vset.pattern.permute.xlu1 %v342_v2  ;;  %283 = vset.pattern.permute.xlu0 %v342_v2  ;;  %v25_v3 = vld [vmem:[%s427_s0 + $0x28] sm:$0xff] }
   0x2   :  { %v20_v1 = vld [vmem:[%s427_s0] sm:$0xff]  ;;  %52 = vperm.xlu1 %284, %v24_v0   ;;  %v21_v4 = vld [vmem:[%s427_s0 + $0x8] sm:$0xff] }
   0x3   :  { %32 = vperm.xlu0 %283, %v20_v1  }
   0x4   :  { %8 = vsyncpa [#allocation4], 0  ;;  %v23_v5 = vld [vmem:[%s427_s0 + $0x18] sm:$0xff]  ;;  %v22_v6 = vld [vmem:[%s427_s0 + $0x10] sm:$0xff]  ;;  %vm130_vm0 = vcmask 130048  }
   0x5   :  { %v27_v7 = vld [vmem:[%s427_s0 + $0x38] sm:$0xff]  ;;  %v26_v8 = vld [vmem:[%s427_s0 + $0x30] sm:$0xff]  ;;  %v285_v9 = vld [vmem:[%s429_s2] sm:$0xff]  }
   0x6   :  { %57 = vperm.xlu1 %284, %v25_v3   ;;  %267 = vmatprep.subr.bf16.mxu0 %v285_v9  ;;  %v28_v10 = vld [vmem:[%s428_s1] sm:$0xff]  ;;  %v29_v15 = vld [vmem:[%s428_s1 + $0x8] sm:$0xff]  ;;  %s343_s1 = smov [#allocation3]  }
   0x7   :  { %37 = vperm.xlu0 %283, %v21_v4   ;;  %277 = vmatprep.subr.bf16.mxu1 %v285_v9  ;;  %s238_s2 = sshll.u32 %s343_s1, 4  ;;  %s239_s2 = int_to_ptr.vmem [resolvable:$true] %s238_s2 }
   0x8   :  { %268 = vmatpush3.bf16.msra.mxu0 %v285_v9  ;;  %278 = vmatpush3.bf16.msra.mxu1 %v285_v9  ;;  %s318_s6 = scalar_lea.vmem %s239_s2, 1024  ;;  %p323_p1 = scmp.lt.s32.totalorder %s239_s2, %s239_s2 }
   0x9   :  { %p319_p0 = scmp.ne.s32.totalorder %s239_s2, %s318_s6  ;;  %p324_p2 = scmp.lt.s32.totalorder %s318_s6, %s318_s6 }
   0xa   :  { %47 = vperm.xlu1 %284, %v23_v5  }
   0xb   :  { %42 = vperm.xlu0 %283, %v22_v6   ;;  %p325_p3 = por %p324_p2, %p323_p1 }
   0xd   :  { %p326_p4 = pnand %p325_p3, %p319_p0 }
   0xe   :  { %67 = vperm.xlu1 %284, %v27_v7  }
   0xf   :  { %62 = vperm.xlu0 %283, %v26_v8  }
  0x81   :  { %v53_v11 = vpop.permute.xlu1 %52 }
  0x82   :  { %v33_v12 = vpop.permute.xlu0 %32  ;;  %v74_v13 = vsub.f32 %v53_v11, %v28_v10 }
  0x83   :  { %v70_v14 = vsub.f32 %v33_v12, %v28_v10 }
  0x84   :  { %v253_v16 = vmul.f32 -1.442695, %v74_v13 }
  0x85   :  { %v249_v17 = vmul.f32 -1.442695, %v70_v14  ;;  %v58_v18 = vpop.permute.xlu1 %57 }
  0x86   :  { %v38_v19 = vpop.permute.xlu0 %37  ;;  %286 = vpow2.f32 %v253_v16  ;;  %v75_v20 = vsub.f32 %v58_v18, %v29_v15 }
  0x87   :  { %v71_v21 = vsub.f32 %v38_v19, %v29_v15  ;;  %288 = vpow2.f32 %v249_v17 }
  0x88   :  { %v254_v22 = vmul.f32 -1.442695, %v75_v20 }
  0x89   :  { %v250_v23 = vmul.f32 -1.442695, %v71_v21  ;;  %v48_v24 = vpop.permute.xlu1 %47 }
  0x8a   :  { %v43_v25 = vpop.permute.xlu0 %42  ;;  %290 = vpow2.f32 %v254_v22  ;;  %v73_v26 = vsub.f32 %v48_v24, %v29_v15 }
  0x8b   :  { %v72_v27 = vsub.f32 %v43_v25, %v28_v10  ;;  %292 = vpow2.f32 %v250_v23 }
  0x8c   :  { %v252_v28 = vmul.f32 -1.442695, %v73_v26 }
  0x8d   :  { %v251_v29 = vmul.f32 -1.442695, %v72_v27  ;;  %v68_v30 = vpop.permute.xlu1 %67 }
  0x8e   :  { %v63_v31 = vpop.permute.xlu0 %62  ;;  %294 = vpow2.f32 %v252_v28  ;;  %v77_v32 = vsub.f32 %v68_v30, %v29_v15 }
  0x8f   :  { %v76_v33 = vsub.f32 %v63_v31, %v28_v10  ;;  %296 = vpow2.f32 %v251_v29 }
  0x90   :  { %v287_v34 = vpop.eup %286  ;;  %v256_v35 = vmul.f32 -1.442695, %v77_v32 }
  0x91   :  { %v289_v36 = vpop.eup %288  ;;  %v106_v37 = vadd.f32 1.0, %v287_v34  ;;  %v255_v38 = vmul.f32 -1.442695, %v76_v33 }
  0x92   :  { %v102_v39 = vadd.f32 1.0, %v289_v36  ;;  %298 = vpow2.f32 %v256_v35 }
  0x93   :  { %300 = vrcp.f32 %v106_v37 }
  0x94   :  { %v291_v40 = vpop.eup %290  ;;  %302 = vpow2.f32 %v255_v38 }
  0x95   :  { %v293_v41 = vpop.eup %292  ;;  %v107_v42 = vadd.f32 1.0, %v291_v40  ;;  %304 = vrcp.f32 %v102_v39 }
  0x96   :  { %v103_v43 = vadd.f32 1.0, %v293_v41 }
  0x97   :  { %306 = vrcp.f32 %v107_v42 }
  0x98   :  { %v295_v44 = vpop.eup %294  ;;  %308 = vrcp.f32 %v103_v43 }
  0x99   :  { %v297_v45 = vpop.eup %296  ;;  %v105_v46 = vadd.f32 1.0, %v295_v44 }
  0x9a   :  { %v104_v47 = vadd.f32 1.0, %v297_v45 }
  0x9b   :  { %310 = vrcp.f32 %v105_v46 }
  0x9c   :  { %v299_v48 = vpop.eup %298  ;;  %312 = vrcp.f32 %v104_v47 }
  0x9d   :  { %v109_v49 = vadd.f32 1.0, %v299_v48  ;;  %v301_v50 = vpop.eup %300 }
  0x9e   :  { %v303_v51 = vpop.eup %302 }
  0x9f   :  { %v305_v52 = vpop.eup %304  ;;  %314 = vrcp.f32 %v109_v49  ;;  %v108_v53 = vadd.f32 1.0, %v303_v51 }
  0xa1   :  { %v307_v54 = vpop.eup %306  ;;  %316 = vrcp.f32 %v108_v53 }
  0xa2   :  { %v309_v55 = vpop.eup %308  ;;  %v128_v56 = vpack.c.bf16 %v307_v54, %v301_v50 }
  0xa3   :  { %v126_v57 = vpack.c.bf16 %v309_v55, %v305_v52 }
  0xa4   :  { %133 = vst.msk [vmem:[#allocation2 + $0x10] sm:$0xff] %vm130_vm0, %v128_v56 }
  0xa5   :  { %v311_v58 = vpop.eup %310  ;;  %131 = vst.msk [vmem:[#allocation2] sm:$0xff] %vm130_vm0, %v126_v57 }
  0xa6   :  { %v313_v59 = vpop.eup %312 }
  0xa7   :  { %v127_v60 = vpack.c.bf16 %v311_v58, %v313_v59 }
  0xa9   :  { %132 = vst.msk [vmem:[#allocation2 + $0x8] sm:$0xff] %vm130_vm0, %v127_v60  ;;  %v315_v61 = vpop.eup %314 }
  0xab   :  { %v137_v62 = vld [vmem:[#allocation2 + $0x10] sm:$0xff]  ;;  %v317_v63 = vpop.eup %316 }
  0xac   :  { %v135_v0 = vld [vmem:[#allocation2] sm:$0xff]  ;;  %273 = vmatprep.mubr.msk.bf16.mxu1 %vm130_vm0, %v137_v62  ;;  %v129_v1 = vpack.c.bf16 %v315_v61, %v317_v63 }
  0xad   :  { %269 = vmatprep.mubr.msk.bf16.mxu0 %vm130_vm0, %v135_v0 }
  0xae   :  { %134 = vst.msk [vmem:[#allocation2 + $0x18] sm:$0xff] %vm130_vm0, %v129_v1 }
  0xb0   :  { %v136_v2 = vld [vmem:[#allocation2 + $0x8] sm:$0xff] }
  0xb1   :  { %270 = vmatmul.mubr.msk.bf16.vlgmr.msra.gmra.mrb[0].mxu0 %vm130_vm0, %v136_v2 }
  0xb5   :  { %v138_v3 = vld [vmem:[#allocation2 + $0x18] sm:$0xff] }
  0xb6   :  { %274 = vmatmul.mubr.msk.bf16.vlgmr.msra.gmra.mrb[0].mxu1 %vm130_vm0, %v138_v3 }
 0x184   :  { %v271_v4 = vpop.f32.mrb[0].mxu0 }
 0x185   :  { %227 = vst.msk [vmem:[#allocation3 + $0x10] sm:$0xff] %vm130_vm0, %v271_v4  ;;  %v194_v5 = vpop.f32.mrb[1].mxu0 }
 0x186   :  { %225 = vst.msk [vmem:[#allocation3] sm:$0xff] %vm130_vm0, %v194_v5  ;;  %v272_v6 = vpop.f32.mrb[2].mxu0 }
 0x187   :  { %228 = vst.msk [vmem:[#allocation3 + $0x18] sm:$0xff] %vm130_vm0, %v272_v6  ;;  %v197_v7 = vpop.f32.mrb[3].mxu0 }
 0x188   :  { %226 = vst.msk [vmem:[#allocation3 + $0x8] sm:$0xff] %vm130_vm0, %v197_v7 }
 0x189   :  { %v275_v8 = vpop.f32.mrb[0].mxu1 }
 0x18a   :  { %231 = vst.msk [vmem:[#allocation3 + $0x30] sm:$0xff] %vm130_vm0, %v275_v8  ;;  %v210_v9 = vpop.f32.mrb[1].mxu1 }
 0x18b   :  { %229 = vst.msk [vmem:[#allocation3 + $0x20] sm:$0xff] %vm130_vm0, %v210_v9  ;;  %v276_v10 = vpop.f32.mrb[2].mxu1 }
 0x18c   :  { %232 = vst.msk [vmem:[#allocation3 + $0x38] sm:$0xff] %vm130_vm0, %v276_v10  ;;  %v213_v11 = vpop.f32.mrb[3].mxu1 }
 0x18d   :  { %230 = vst.msk [vmem:[#allocation3 + $0x28] sm:$0xff] %vm130_vm0, %v213_v11 }
 0x18e   :  { %329 = shalt.err (!%p326_p4)
}
 0x18f   :  { %s330_s9 = scalar_lea.hbm %s430_s3, 1024 }
 0x190   :  { %p331_p5 = scmp.ne.s32.totalorder %s430_s3, %s330_s9  ;;  %p334_p6 = scmp.lt.u32.totalorder %s330_s9, %s430_s3 }
 0x192   :  { %p336_p7 = pnand %p334_p6, %p331_p5 }
 0x194   :  { %339 = shalt.err (!%p336_p7)
}
 0x195   :  { %s344_s14 = smov 128   ;;  %s345_s15 = smov 8  }
 0x196   :  { %244 = dma.vmem_to_hbm [thread:$0]  %s239_s2, 1024, %s430_s3, [#allocation4], %s344_s14, %s344_s14, %s345_s15  }
 0x197   :  { %340 = dma.done.wait [#allocation4], 1024  }
 0x198   :  { %341 = vsyncadd [#allocation4], 4294966272 }
 0x199   :  { %248 = vsyncpa [#allocation4], 1 }

</bundles_post_ra>
